<compile_context>
chip_gen: v6e
topology: v6e:2x2x1
jax: 0.10.0
libtpu: 0.0.40
codegen_flags: <defaults>
</compile_context>

<pallas_src>
import jax
import jax.numpy as jnp
from jax.experimental import pallas as pl
from jax.experimental.pallas import tpu as pltpu


def _round_up(x: int, m: int) -> int:
    return ((x + m - 1) // m) * m


def _togray_kernel(w_ref, b_ref, x_ref, o_ref):
    # w_ref: VMEM (C_out, C_in) f32 (full tiny array)
    # b_ref: VMEM (C_out, 1)   f32
    # x_ref: VMEM (C_in, T)        (T = lane-dense pixel tile, multiple of 128)
    # o_ref: VMEM (C_out, T)
    c_in = x_ref.shape[0]
    c_out, tile = o_ref.shape

    w = w_ref[...].astype(jnp.float32)                       # tiny, ~1 vreg
    # Dense (C_out, T) accumulator seeded with the lane-broadcast bias:
    # no per-row concat / sublane-interleave epilogue.
    acc = jnp.broadcast_to(b_ref[...].astype(jnp.float32), (c_out, tile))
    for ic in range(c_in):                                   # statically unrolled
        # Load each input row right where it is consumed (short live range);
        # (C_out,1) * (1,T) broadcast-FMA on the VPU — no MXU, no padded matmul.
        acc = acc + w[:, ic:ic + 1] * x_ref[ic:ic + 1, :].astype(jnp.float32)
    # tanh on the dense (C_out, T) tile (EUP has slack; kernel is HBM-bound).
    o_ref[...] = jnp.tanh(acc).astype(o_ref.dtype)


def _tile_cap_and_vmem_limit():
    """Generation-aware pixel-tile cap and scoped-VMEM request.

    Per-step VMEM ~= 2 (double-buffer) * 8 sublanes * 4 B * T for input and
    output each (+ accumulator temporaries) ~= 160-200 B per tile pixel.
    """
    kind = ""
    try:
        kind = jax.devices()[0].device_kind.lower()
    except Exception:
        pass
    if "v6" in kind:
        # v6e: 128 MiB physical VMEM, 1.4 TB/s HBM -> go big (~50 MiB of buffers).
        return 262144, 96 << 20
    # v7x: only 64 MiB physical VMEM; v5e: slow enough HBM that 128K pixels
    # already hides the ~0.35us/step overhead.  48 MiB scoped VMEM is safe on
    # every generation (~28 MiB actually used at T=128K).
    return 131072, 48 << 20


@jax.jit
def togray_conv(x_nchw, weight, bias):
    """1x1 conv + tanh.

    x_nchw: (N, C_in, H, W) float32
    weight: (C_out, C_in)   float32  (Conv2d weight (C_out, C_in, 1, 1) squeezed)
    bias:   (C_out,)        float32
    returns (N, C_out, H, W) float32
    """
    N, C_in, H, W = x_nchw.shape
    C_out = weight.shape[0]
    HW = H * W

    # NCHW -> (N, C_in, H*W): free reshape, pixels land on the lane axis.
    x = x_nchw.reshape(N, C_in, HW)
    w2d = weight.astype(jnp.float32)
    b2d = bias.reshape(C_out, 1).astype(jnp.float32)

    cap, vmem_limit = _tile_cap_and_vmem_limit()
    tile = min(_round_up(HW, 128), cap)                      # lane-dense tile
    # v7x dual-TC: guarantee >=2 grid blocks for single-image calls.
    if N == 1 and pl.cdiv(HW, tile) < 2 and HW > 128:
        tile = _round_up(pl.cdiv(HW, 2), 128)
    grid = (N, pl.cdiv(HW, tile))   # partial tail block is masked by Pallas

    cost = pl.CostEstimate(
        flops=2 * N * HW * C_in * C_out,
        transcendentals=N * HW * C_out,
        bytes_accessed=4 * N * HW * (C_in + C_out),
    )

    out = pl.pallas_call(
        _togray_kernel,
        out_shape=jax.ShapeDtypeStruct((N, C_out, HW), x_nchw.dtype),
        grid_spec=pltpu.PrefetchScalarGridSpec(
            num_scalar_prefetch=0,
            grid=grid,
            in_specs=[
                pl.BlockSpec((C_out, C_in), lambda n, p: (0, 0)),   # weight (tiny)
                pl.BlockSpec((C_out, 1), lambda n, p: (0, 0)),      # bias column
                pl.BlockSpec((None, C_in, tile), lambda n, p: (n, 0, p)),
            ],
            out_specs=pl.BlockSpec((None, C_out, tile), lambda n, p: (n, 0, p)),
        ),
        compiler_params=pltpu.CompilerParams(
            dimension_semantics=("parallel", "parallel"),
            vmem_limit_bytes=vmem_limit,
        ),
        cost_estimate=cost,
    )(w2d, b2d, x)

    # (N, C_out, H*W) -> NCHW: free reshape.
    return out.reshape(N, C_out, H, W)


def init_params(key, in_channel, out_channel):
    # Deterministic init mimicking PyTorch Conv2d default (uniform +-1/sqrt(fan_in)).
    kw, kb = jax.random.split(key)
    fan_in = in_channel * 1 * 1
    bound = 1.0 / jnp.sqrt(fan_in)
    weight = jax.random.uniform(kw, (out_channel, in_channel), jnp.float32,
                                minval=-bound, maxval=bound)
    bias = jax.random.uniform(kb, (out_channel,), jnp.float32,
                              minval=-bound, maxval=bound)
    return weight, bias


if __name__ == "__main__":
    key = jax.random.PRNGKey(0)
    k_x, k_p = jax.random.split(key)

    N, C_in, H, W = 2, 4, 16, 16
    C_out = 3  # "ToGray"-style output channels

    x = jax.random.normal(k_x, (N, C_in, H, W), jnp.float32)
    weight, bias = init_params(k_p, C_in, C_out)

    out = jax.block_until_ready(togray_conv(x, weight, bias))

    # Reference check (plain JAX einsum, same math as Conv2d 1x1 + tanh).
    ref = jnp.tanh(
        jnp.einsum("nchw,oc->nohw", x, weight) + bias[None, :, None, None]
    )
    assert out.shape == (N, C_out, H, W)
    assert jnp.allclose(out, ref, atol=1e-5, rtol=1e-5), \
        float(jnp.max(jnp.abs(out - ref)))

    print("KERNEL_OK")
</pallas_src>

<mosaic_0001>
module attributes {stable_mosaic.version = 11 : i64} {
  func.func @_togray_kernel(%arg0: i32, %arg1: i32, %arg2: memref<3x4xf32, #tpu.memory_space<vmem>>, %arg3: memref<3x1xf32, #tpu.memory_space<vmem>>, %arg4: memref<1x4x256xf32, #tpu.memory_space<vmem>>, %arg5: memref<1x3x256xf32, #tpu.memory_space<vmem>>) attributes {dimension_semantics = [#tpu.dimension_semantics<parallel>, #tpu.dimension_semantics<parallel>], iteration_bounds = array<i64: 2, 1>, scalar_prefetch = 0 : i64, scratch_operands = 0 : i64, tpu.core_type = #tpu.core_type<tc>, window_params = [{pipeline_mode = #tpu.pipeline_mode<synchronous>, transform_indices = @transform_0, window_bounds = array<i64: 3, 4>}, {pipeline_mode = #tpu.pipeline_mode<synchronous>, transform_indices = @transform_1, window_bounds = array<i64: 3, 1>}, {transform_indices = @transform_2, window_bounds = array<i64: 1, 4, 256>}, {transform_indices = @transform_3, window_bounds = array<i64: 1, 3, 256>}]} {
    %c0 = arith.constant 0 : index
    %c0_0 = arith.constant 0 : index
    %0 = vector.load %arg2[%c0, %c0_0] : memref<3x4xf32, #tpu.memory_space<vmem>>, vector<3x4xf32>
    %c0_1 = arith.constant 0 : index
    %c0_2 = arith.constant 0 : index
    %1 = vector.load %arg3[%c0_1, %c0_2] : memref<3x1xf32, #tpu.memory_space<vmem>>, vector<3x1xf32>
    %2 = vector.shape_cast %1 : vector<3x1xf32> to vector<3x1xf32>
    %3 = vector.broadcast %2 : vector<3x1xf32> to vector<3x256xf32>
    %4 = vector.extract_strided_slice %0 {offsets = [0, 0], sizes = [3, 1], strides = [1, 1]} : vector<3x4xf32> to vector<3x1xf32>
    %c0_3 = arith.constant 0 : index
    %c0_4 = arith.constant 0 : index
    %c0_5 = arith.constant 0 : index
    %5 = vector.load %arg4[%c0_3, %c0_4, %c0_5] : memref<1x4x256xf32, #tpu.memory_space<vmem>>, vector<1x1x256xf32>
    %6 = vector.shape_cast %5 : vector<1x1x256xf32> to vector<1x256xf32>
    %7 = vector.broadcast %4 : vector<3x1xf32> to vector<3x256xf32>
    %8 = vector.broadcast %6 : vector<1x256xf32> to vector<3x256xf32>
    %9 = arith.mulf %7, %8 : vector<3x256xf32>
    %10 = arith.addf %3, %9 : vector<3x256xf32>
    %11 = vector.extract_strided_slice %0 {offsets = [0, 1], sizes = [3, 1], strides = [1, 1]} : vector<3x4xf32> to vector<3x1xf32>
    %c0_6 = arith.constant 0 : index
    %c1 = arith.constant 1 : index
    %c0_7 = arith.constant 0 : index
    %12 = vector.load %arg4[%c0_6, %c1, %c0_7] : memref<1x4x256xf32, #tpu.memory_space<vmem>>, vector<1x1x256xf32>
    %13 = vector.shape_cast %12 : vector<1x1x256xf32> to vector<1x256xf32>
    %14 = vector.broadcast %11 : vector<3x1xf32> to vector<3x256xf32>
    %15 = vector.broadcast %13 : vector<1x256xf32> to vector<3x256xf32>
    %16 = arith.mulf %14, %15 : vector<3x256xf32>
    %17 = arith.addf %10, %16 : vector<3x256xf32>
    %18 = vector.extract_strided_slice %0 {offsets = [0, 2], sizes = [3, 1], strides = [1, 1]} : vector<3x4xf32> to vector<3x1xf32>
    %c0_8 = arith.constant 0 : index
    %c2 = arith.constant 2 : index
    %c0_9 = arith.constant 0 : index
    %19 = vector.load %arg4[%c0_8, %c2, %c0_9] : memref<1x4x256xf32, #tpu.memory_space<vmem>>, vector<1x1x256xf32>
    %20 = vector.shape_cast %19 : vector<1x1x256xf32> to vector<1x256xf32>
    %21 = vector.broadcast %18 : vector<3x1xf32> to vector<3x256xf32>
    %22 = vector.broadcast %20 : vector<1x256xf32> to vector<3x256xf32>
    %23 = arith.mulf %21, %22 : vector<3x256xf32>
    %24 = arith.addf %17, %23 : vector<3x256xf32>
    %25 = vector.extract_strided_slice %0 {offsets = [0, 3], sizes = [3, 1], strides = [1, 1]} : vector<3x4xf32> to vector<3x1xf32>
    %c0_10 = arith.constant 0 : index
    %c3 = arith.constant 3 : index
    %c0_11 = arith.constant 0 : index
    %26 = vector.load %arg4[%c0_10, %c3, %c0_11] : memref<1x4x256xf32, #tpu.memory_space<vmem>>, vector<1x1x256xf32>
    %27 = vector.shape_cast %26 : vector<1x1x256xf32> to vector<1x256xf32>
    %28 = vector.broadcast %25 : vector<3x1xf32> to vector<3x256xf32>
    %29 = vector.broadcast %27 : vector<1x256xf32> to vector<3x256xf32>
    %30 = arith.mulf %28, %29 : vector<3x256xf32>
    %31 = arith.addf %24, %30 : vector<3x256xf32>
    %32 = math.tanh %31 : vector<3x256xf32>
    %c0_12 = arith.constant 0 : index
    %c0_13 = arith.constant 0 : index
    %c0_14 = arith.constant 0 : index
    %33 = vector.load %arg5[%c0_12, %c0_13, %c0_14] : memref<1x3x256xf32, #tpu.memory_space<vmem>>, vector<1x3x256xf32>
    %34 = vector.shape_cast %33 : vector<1x3x256xf32> to vector<3x256xf32>
    %35 = vector.shape_cast %32 : vector<3x256xf32> to vector<1x3x256xf32>
    tpu.vector_store %arg5[%c0_12, %c0_13, %c0_14], %35 {strides = array<i32>} : memref<1x3x256xf32, #tpu.memory_space<vmem>>, vector<1x3x256xf32>,
    return
  }
  func.func @transform_0(%arg0: i32, %arg1: i32) -> (i32, i32) {
    %c0_i32 = arith.constant 0 : i32
    %c0_i32_0 = arith.constant 0 : i32
    %c0_i32_1 = arith.constant 0 : i32
    return %c0_i32, %c0_i32_0 : i32, i32
  }
  func.func @transform_1(%arg0: i32, %arg1: i32) -> (i32, i32) {
    %c0_i32 = arith.constant 0 : i32
    %c0_i32_0 = arith.constant 0 : i32
    %c0_i32_1 = arith.constant 0 : i32
    return %c0_i32, %c0_i32_0 : i32, i32
  }
  func.func @transform_2(%arg0: i32, %arg1: i32) -> (i32, i32, i32) {
    %c0_i32 = arith.constant 0 : i32
    %c0_i32_0 = arith.constant 0 : i32
    return %arg0, %c0_i32, %arg1 : i32, i32, i32
  }
  func.func @transform_3(%arg0: i32, %arg1: i32) -> (i32, i32, i32) {
    %c0_i32 = arith.constant 0 : i32
    %c0_i32_0 = arith.constant 0 : i32
    return %arg0, %c0_i32, %arg1 : i32, i32, i32
  }
}

</mosaic_0001>

<bundles_post_ra>
// kernel: togray_conv.1
= control target key start
LH: loop header
LB: loop body
LE: loop exit
PB: predicated region body
PF: predicated region fallthrough
CT: control target
= control target key end

     0   :  { %s495_s12 = smov 0   ;;  %s497_s13 = smov 0   ;;  %s541_s0 = inlined_call_operand.vmem [shape: f32[3,4], index: 0, kind: input, shape index: {}]   ;;  %s542_s1 = inlined_call_operand.vmem [shape: f32[3,1], index: 1, kind: input, shape index: {}]   ;;  %s543_s2 = inlined_call_operand.vmem [shape: f32[2,4,256], index: 2, kind: input, shape index: {}]   ;;  %s544_s3 = inlined_call_operand.vmem [shape: f32[2,3,256], index: 3, kind: output, shape index: {}]  }
   0x1   :  { %s499_s14 = smov 0  }
   0x2 LB: > { %s25_s15 = sadd.s32 1, %s465_s13  ;;  %p399_p0 = scmp.ge.s32.totalorder %s469_s14, 1  ;;  %s469_s14 = sphi %s499_s14, %s13_s14   ;;  %s465_s13 = sphi %s497_s13, %s546_s13   ;;  %s461_s12 = sphi %s495_s12, %s545_s12  }
   0x3   : > { %p27_p1 = scmp.ge.s32.totalorder %s25_s15, 2  ;;  %p158_p2 = scmp.lt.s32.totalorder %s469_s14, 3 }
   0x5   : > { %s548_s15 = smov (%p27_p1, %s25_s15), 0  ;;  %p159_p3 = pnand %p399_p0, %p158_p2 }
   0x6   : > { %p191_p4 = scmp.lt.s32.totalorder (!%p159_p3), %s461_s12, 1 }
   0x7   : > { %162 = sbr.rel (%p159_p3) target bundleno = 169 (0xa9), region = 32 }
   0xc   : > { %v210_v0 = vld [vmem:[%s541_s0] sm:$0x7]  ;;  %v471_v1 = vmov 0   ;;  %v472_v2 = vmov 1   ;;  %v473_v4 = vmov 2   ;;  %v474_v5 = vmov 3  }
   0xd   : > { %439 = vset.pattern.permute.xlu0 %v471_v1  ;;  %440 = vset.pattern.permute.xlu1 %v472_v2  ;;  %v211_v3 = vld [vmem:[%s542_s1] sm:$0x7]  ;;  %s550_s12 = smov (!%p191_p4, %s461_s12), 1  ;;  %v224_v6 = vlaneseq }
   0xe   : > { %220 = vperm.xlu0 %439, %v210_v0   ;;  %241 = vperm.xlu1 %440, %v210_v0   ;;  %s409_s20 = sshll.u32 %s550_s12, 3 }
   0xf   : > { %v225_v7 = vshrl.u32 %v224_v6, 7  ;;  %s198_s23 = scalar_lea.vmem %s543_s2, %s409_s20  ;;  %s208_s26 = scalar_lea.vmem %s544_s3, %s409_s20 }
  0x10   : > { %v217_v10 = vld [vmem:[%s198_s23] ss:$4 sm:$0x3]  ;;  %v404_v11 = vld [vmem:[%s198_s23 + $0x1] ss:$4 sm:$0x3] }
  0x11   : > { %v226_v8 = vsub.s32 0, %v225_v7  ;;  %v230_v9 = vsub.s32 1, %v225_v7  ;;  %v405_v14 = vld [vmem:[%s198_s23 + $0x2] ss:$4 sm:$0x3] }
  0x12   : > { %214 = vperm.xlu0 %439, %v211_v3   ;;  %441 = vset.pattern.permute.xlu1 %v473_v4  ;;  %v406_v23 = vld [vmem:[%s198_s23 + $0x3] ss:$4 sm:$0x3] }
  0x13   : > { %262 = vperm.xlu1 %441, %v210_v0   ;;  %v227_v12 = vrot.slane %v217_v10, %v226_v8  ;;  %v231_v13 = vrot.slane %v217_v10, %v230_v9  ;;  %v248_v17 = vrot.slane %v404_v11, %v226_v8  ;;  %v252_v18 = vrot.slane %v404_v11, %v230_v9 }
  0x14   : > { %v269_v19 = vrot.slane %v405_v14, %v226_v8  ;;  %v273_v20 = vrot.slane %v405_v14, %v230_v9  ;;  %v290_v32 = vrot.slane %v406_v23, %v226_v8  ;;  %v294_v33 = vrot.slane %v406_v23, %v230_v9 }
  0x16   : > { %442 = vset.pattern.permute.xlu0 %v474_v5 }
  0x17   : > { %283 = vperm.xlu0 %442, %v210_v0  }
  0x89   : > { %v221_v15 = vpop.permute.xlu0 %220  ;;  %v242_v16 = vpop.permute.xlu1 %241 }
  0x8a   : > { %v234_v21 = vmul.f32 %v227_v12, %v221_v15  ;;  %v235_v22 = vmul.f32 %v231_v13, %v221_v15  ;;  %v255_v25 = vmul.f32 %v248_v17, %v242_v16  ;;  %v256_v26 = vmul.f32 %v252_v18, %v242_v16 }
  0x8d   : > { %v215_v24 = vpop.permute.xlu0 %214 }
  0x8e   : > { %v236_v27 = vadd.f32 %v234_v21, %v215_v24  ;;  %v237_v28 = vadd.f32 %v235_v22, %v215_v24  ;;  %v263_v29 = vpop.permute.xlu1 %262 }
  0x8f   : > { %v276_v30 = vmul.f32 %v269_v19, %v263_v29  ;;  %v277_v31 = vmul.f32 %v273_v20, %v263_v29 }
  0x90   : > { %v257_v34 = vadd.f32 %v255_v25, %v236_v27  ;;  %v258_v35 = vadd.f32 %v256_v26, %v237_v28 }
  0x92   : > { %v278_v36 = vadd.f32 %v276_v30, %v257_v34  ;;  %v279_v37 = vadd.f32 %v277_v31, %v258_v35  ;;  %v284_v38 = vpop.permute.xlu0 %283 }
  0x93   : > { %v297_v39 = vmul.f32 %v290_v32, %v284_v38  ;;  %v298_v40 = vmul.f32 %v294_v33, %v284_v38 }
  0x95   : > { %v299_v41 = vadd.f32 %v297_v39, %v278_v36  ;;  %v300_v42 = vadd.f32 %v298_v40, %v279_v37 }
  0x97   : > { %443 = vtanh.f32 %v299_v41 }
  0x98   : > { %445 = vtanh.f32 %v300_v42 }
  0xa4   : > { %v444_v43 = vpop.eup %443 }
  0xa5   : > { %v446_v44 = vpop.eup %445 }
  0xa6   : > { %v305_v45 = vcombine.low %v444_v43, %v446_v44 }
  0xa8   : > { %307 = vst [vmem:[%s208_s26] sm:$0x77] %v305_v45 }
  0xa9 PF: > { %s13_s14 = sadd.s32 1, %s469_s14   ;;  %s545_s12 = smov %s465_s13 }
  0xaa   : > { %p10_p5 = scmp.ge.s32.totalorder %s13_s14, 4   ;;  %s546_s13 = smov %s548_s15 }
  0xac   :  { %12 = sbr.rel (!%p10_p5) target bundleno = 2 (0x2), region = 65 }

</bundles_post_ra>
